<compile_context>
chip_gen: v7x
topology: tpu7x:2x2x1
jax: 0.10.0
libtpu: 0.0.40
codegen_flags: <defaults>
</compile_context>

<pallas_src>
import jax
import jax.numpy as jnp
from jax.experimental import pallas as pl
from jax.experimental.pallas import tpu as pltpu

EPS = 1e-5


def bn_conv1x1_kernel(x_ref, gamma_ref, beta_ref, w_ref, o_ref):
    # x_ref:     (C_in, P)        channels-first pixel matrix
    # gamma_ref: (C_in, 1)
    # beta_ref:  (C_in, 1)
    # w_ref:     (C_out_blk, C_in) 1x1 conv weight block
    # o_ref:     (C_out_blk, P)
    x = x_ref[...]                                    # f32 (C_in, P)
    inv_p = 1.0 / x.shape[1]                          # static trace-time const

    # One-pass batch statistics per input channel (over all N*H*W pixels).
    s1 = jnp.sum(x, axis=1, keepdims=True)            # (C_in, 1)
    s2 = jnp.sum(x * x, axis=1, keepdims=True)        # (C_in, 1)
    mean = s1 * inv_p
    var = s2 * inv_p - mean * mean                    # biased variance

    # Fold BN into per-channel affine: 2 VALU ops / element on x.
    a = gamma_ref[...] * jax.lax.rsqrt(var + EPS)     # (C_in, 1)
    b = beta_ref[...] - mean * a                      # (C_in, 1)
    x_bn = (x * a + b).astype(jnp.bfloat16)           # (C_in, P)

    # 1x1 conv == channels-first matmul on the MXU (bf16 in, f32 accumulate).
    w = w_ref[...].astype(jnp.bfloat16)               # (C_out_blk, C_in)
    o_ref[...] = jnp.dot(
        w, x_bn, preferred_element_type=jnp.float32
    ).astype(o_ref.dtype)


def bn_conv1x1(x_nchw, gamma, beta, conv_weight):
    """x_nchw: [N, C_in, H, W]; conv_weight: [C_out, C_in, 1, 1] (PyTorch)."""
    N, C_in, H, W = x_nchw.shape
    C_out = conv_weight.shape[0]
    P = N * H * W

    # Channels-first pixel matrix.  N == 1 -> free reshape, no transpose.
    if N == 1:
        x_cf = x_nchw.reshape(C_in, P)
    else:
        x_cf = jnp.transpose(x_nchw, (1, 0, 2, 3)).reshape(C_in, P)

    w2d = conv_weight.reshape(C_out, C_in)            # (C_out, C_in), free
    gamma2 = gamma.reshape(C_in, 1)
    beta2 = beta.reshape(C_in, 1)

    # 2-way split of C_out: parallel across the two v7x TensorCores, and
    # pipelined output writeback on single-core chips.
    n_blk = 2 if (C_out % 2 == 0 and (C_out // 2) % 8 == 0) else 1
    c_blk = C_out // n_blk

    out_cf = pl.pallas_call(
        bn_conv1x1_kernel,
        out_shape=jax.ShapeDtypeStruct((C_out, P), x_nchw.dtype),
        grid=(n_blk,),
        in_specs=[
            pl.BlockSpec((C_in, P), lambda i: (0, 0)),     # x: resident
            pl.BlockSpec((C_in, 1), lambda i: (0, 0)),     # gamma
            pl.BlockSpec((C_in, 1), lambda i: (0, 0)),     # beta
            pl.BlockSpec((c_blk, C_in), lambda i: (i, 0)), # weight block
        ],
        out_specs=pl.BlockSpec((c_blk, P), lambda i: (i, 0)),
        compiler_params=pltpu.CompilerParams(
            dimension_semantics=("parallel",)),
    )(x_cf, gamma2, beta2, w2d)

    if N == 1:
        return out_cf.reshape(1, C_out, H, W)
    return jnp.transpose(out_cf.reshape(C_out, N, H, W), (1, 0, 2, 3))


if __name__ == "__main__":
    key = jax.random.PRNGKey(0)
    kx, kw, kg, kb = jax.random.split(key, 4)

    # Shapes from the module's forward: x86 = randn([1, 48, 28, 28]).
    N, C_IN, H, W = 1, 48, 28, 28
    C_OUT = 288

    x = jax.random.normal(kx, (N, C_IN, H, W), dtype=jnp.float32)

    # Deterministic parameters.  BatchNorm2d(48): gamma ~ 1, beta ~ 0 (slightly
    # perturbed so the affine path is exercised).  Conv2d(48, 288, 1x1, no
    # bias): kaiming-uniform-style bound = 1/sqrt(fan_in).
    gamma = jnp.ones((C_IN,), jnp.float32) + 0.01 * jax.random.normal(kg, (C_IN,))
    beta = 0.01 * jax.random.normal(kb, (C_IN,))
    bound = 1.0 / jnp.sqrt(jnp.float32(C_IN))
    conv_w = jax.random.uniform(
        kw, (C_OUT, C_IN, 1, 1), minval=-bound, maxval=bound, dtype=jnp.float32
    )

    out = jax.jit(bn_conv1x1)(x, gamma, beta, conv_w)
    jax.block_until_ready(out)

    # Pure-JAX f32 reference (training-mode BN forward + 1x1 conv).
    mean = jnp.mean(x, axis=(0, 2, 3), keepdims=True)
    var = jnp.mean((x - mean) ** 2, axis=(0, 2, 3), keepdims=True)
    x_bn = (x - mean) / jnp.sqrt(var + EPS) * gamma[None, :, None, None] \
        + beta[None, :, None, None]
    ref = jax.lax.conv_general_dilated(
        x_bn, conv_w, window_strides=(1, 1), padding="VALID",
        dimension_numbers=("NCHW", "OIHW", "NCHW"))

    assert out.shape == (N, C_OUT, H, W)
    # Tolerance covers bf16 MXU operands (f32 accumulation); observed error at
    # these magnitudes is a few 1e-3.
    assert jnp.allclose(out, ref, atol=2e-2, rtol=2e-2), \
        float(jnp.max(jnp.abs(out - ref)))

    print("KERNEL_OK")
</pallas_src>

<mosaic_0001>
module attributes {stable_mosaic.version = 11 : i64} {
  func.func @bn_conv1x1_kernel(%arg0: i32, %arg1: memref<48x784xf32, #tpu.memory_space<vmem>>, %arg2: memref<48x1xf32, #tpu.memory_space<vmem>>, %arg3: memref<48x1xf32, #tpu.memory_space<vmem>>, %arg4: memref<144x48xf32, #tpu.memory_space<vmem>>, %arg5: memref<144x784xf32, #tpu.memory_space<vmem>>) attributes {dimension_semantics = [#tpu.dimension_semantics<parallel>], iteration_bounds = array<i64: 2>, scalar_prefetch = 0 : i64, scratch_operands = 0 : i64, tpu.core_type = #tpu.core_type<tc>, window_params = [{pipeline_mode = #tpu.pipeline_mode<synchronous>, transform_indices = @transform_0, window_bounds = array<i64: 48, 784>}, {pipeline_mode = #tpu.pipeline_mode<synchronous>, transform_indices = @transform_1, window_bounds = array<i64: 48, 1>}, {pipeline_mode = #tpu.pipeline_mode<synchronous>, transform_indices = @transform_2, window_bounds = array<i64: 48, 1>}, {transform_indices = @transform_3, window_bounds = array<i64: 144, 48>}, {transform_indices = @transform_4, window_bounds = array<i64: 144, 784>}]} {
    %c0 = arith.constant 0 : index
    %c0_0 = arith.constant 0 : index
    %0 = vector.load %arg1[%c0, %c0_0] : memref<48x784xf32, #tpu.memory_space<vmem>>, vector<48x784xf32>
    %cst = arith.constant dense<0.000000e+00> : vector<48xf32>
    %1 = vector.multi_reduction <add>, %0, %cst [1] : vector<48x784xf32> to vector<48xf32>
    %2 = vector.shape_cast %1 : vector<48xf32> to vector<48x1xf32>
    %3 = arith.mulf %0, %0 : vector<48x784xf32>
    %cst_1 = arith.constant dense<0.000000e+00> : vector<48xf32>
    %4 = vector.multi_reduction <add>, %3, %cst_1 [1] : vector<48x784xf32> to vector<48xf32>
    %5 = vector.shape_cast %4 : vector<48xf32> to vector<48x1xf32>
    %cst_2 = arith.constant 0.00127551018 : f32
    %6 = vector.broadcast %cst_2 : f32 to vector<48x1xf32>
    %7 = arith.mulf %2, %6 : vector<48x1xf32>
    %cst_3 = arith.constant 0.00127551018 : f32
    %8 = vector.broadcast %cst_3 : f32 to vector<48x1xf32>
    %9 = arith.mulf %5, %8 : vector<48x1xf32>
    %10 = arith.mulf %7, %7 : vector<48x1xf32>
    %11 = arith.subf %9, %10 : vector<48x1xf32>
    %c0_4 = arith.constant 0 : index
    %c0_5 = arith.constant 0 : index
    %12 = vector.load %arg2[%c0_4, %c0_5] : memref<48x1xf32, #tpu.memory_space<vmem>>, vector<48x1xf32>
    %cst_6 = arith.constant 9.99999974E-6 : f32
    %13 = vector.broadcast %cst_6 : f32 to vector<48x1xf32>
    %14 = arith.addf %11, %13 : vector<48x1xf32>
    %15 = math.rsqrt %14 : vector<48x1xf32>
    %16 = arith.mulf %12, %15 : vector<48x1xf32>
    %c0_7 = arith.constant 0 : index
    %c0_8 = arith.constant 0 : index
    %17 = vector.load %arg3[%c0_7, %c0_8] : memref<48x1xf32, #tpu.memory_space<vmem>>, vector<48x1xf32>
    %18 = arith.mulf %7, %16 : vector<48x1xf32>
    %19 = arith.subf %17, %18 : vector<48x1xf32>
    %20 = vector.broadcast %16 : vector<48x1xf32> to vector<48x784xf32>
    %21 = arith.mulf %0, %20 : vector<48x784xf32>
    %22 = vector.broadcast %19 : vector<48x1xf32> to vector<48x784xf32>
    %23 = arith.addf %21, %22 : vector<48x784xf32>
    %24 = arith.truncf %23 : vector<48x784xf32> to vector<48x784xbf16>
    %c0_9 = arith.constant 0 : index
    %c0_10 = arith.constant 0 : index
    %25 = vector.load %arg4[%c0_9, %c0_10] : memref<144x48xf32, #tpu.memory_space<vmem>>, vector<144x48xf32>
    %26 = arith.truncf %25 : vector<144x48xf32> to vector<144x48xbf16>
    %cst_11 = arith.constant dense<0.000000e+00> : vector<144x784xf32>
    %27 = tpu.matmul %26, %24, %cst_11 {dimension_numbers = #tpu.dot_dimension_numbers<[1], [0], [0], [1], [0, 0, 1, 1], [], []>} : vector<144x48xbf16>, vector<48x784xbf16>, vector<144x784xf32> -> vector<144x784xf32>
    %c0_12 = arith.constant 0 : index
    %c0_13 = arith.constant 0 : index
    %28 = vector.load %arg5[%c0_12, %c0_13] : memref<144x784xf32, #tpu.memory_space<vmem>>, vector<144x784xf32>
    tpu.vector_store %arg5[%c0_12, %c0_13], %27 {strides = array<i32>} : memref<144x784xf32, #tpu.memory_space<vmem>>, vector<144x784xf32>,
    return
  }
  func.func @transform_0(%arg0: i32) -> (i32, i32) {
    %c0_i32 = arith.constant 0 : i32
    %c0_i32_0 = arith.constant 0 : i32
    %c0_i32_1 = arith.constant 0 : i32
    return %c0_i32, %c0_i32_0 : i32, i32
  }
  func.func @transform_1(%arg0: i32) -> (i32, i32) {
    %c0_i32 = arith.constant 0 : i32
    %c0_i32_0 = arith.constant 0 : i32
    %c0_i32_1 = arith.constant 0 : i32
    return %c0_i32, %c0_i32_0 : i32, i32
  }
  func.func @transform_2(%arg0: i32) -> (i32, i32) {
    %c0_i32 = arith.constant 0 : i32
    %c0_i32_0 = arith.constant 0 : i32
    %c0_i32_1 = arith.constant 0 : i32
    return %c0_i32, %c0_i32_0 : i32, i32
  }
  func.func @transform_3(%arg0: i32) -> (i32, i32) {
    %c0_i32 = arith.constant 0 : i32
    %c0_i32_0 = arith.constant 0 : i32
    return %arg0, %c0_i32 : i32, i32
  }
  func.func @transform_4(%arg0: i32) -> (i32, i32) {
    %c0_i32 = arith.constant 0 : i32
    %c0_i32_0 = arith.constant 0 : i32
    return %arg0, %c0_i32 : i32, i32
  }
}

</mosaic_0001>

<bundles_post_ra>
// kernel: bn_conv1x1.1
= control target key start
LH: loop header
LB: loop body
LE: loop exit
PB: predicated region body
PF: predicated region fallthrough
CT: control target
= control target key end

     0   :  { %s1502_s15 = smov 0   ;;  %s2349_s0 = inlined_call_operand.vmem [shape: f32[48,784], index: 0, kind: input, shape index: {}]   ;;  %s2350_s1 = inlined_call_operand.vmem [shape: f32[48,1], index: 1, kind: input, shape index: {}]   ;;  %s2351_s2 = inlined_call_operand.vmem [shape: f32[48,1], index: 2, kind: input, shape index: {}]   ;;  %s2352_s3 = inlined_call_operand.vmem [shape: f32[288,48], index: 3, kind: input, shape index: {}]   ;;  %s2353_s4 = inlined_call_operand.vmem [shape: f32[288,784], index: 4, kind: output, shape index: {}]  }
   0x1 LB: > { %s1341_s16 = sadd.s32 4294967295, %s1472_s15   ;;  %p1345_p0 = scmp.ge.s32.totalorder %s1472_s15, 1  ;;  %s1472_s15 = sphi %s1502_s15, %s14_s15  }
   0x2   : > { %p163_p1 = scmp.lt.s32.totalorder %s1472_s15, 3 }
   0x4   : > { %p164_p2 = pnand %p1345_p0, %p163_p1 }
   0x6   : > { %167 = sbr.rel (%p164_p2) target bundleno = 722 (0x2d2), region = 36 }
   0xd   : > { %v1513_v0 = vld [vmem:[%s2349_s0 + $0xa8] sm:$0xff]  ;;  %v1518_v1 = vld [vmem:[%s2349_s0 + $0xb0] sm:$0xff]  ;;  %v1523_v2 = vld [vmem:[%s2349_s0 + $0xb8] sm:$0xff]  ;;  %vm251_vm0 = vcmask 130048   ;;  %s190_s29 = smul.u32 18, %s1341_s16  ;;  %vm655_vm1 = vcmask 392192  }
   0xe   : > { %v1528_v3 = vld [vmem:[%s2349_s0 + $0xc0] sm:$0xff]  ;;  %v274_v4 = vadd.f32 %v1518_v1, %v1513_v0  ;;  %v1535_v5 = vld [vmem:[%s2349_s0 + $0xd8] sm:$0xff]  ;;  %v1545_v7 = vld [vmem:[%s2349_s0 + $0x8] sm:$0xff]  ;;  %v1549_v8 = vmul.f32 %v1513_v0, %v1513_v0  ;;  %v1553_v9 = vmul.f32 %v1518_v1, %v1518_v1  ;;  %v1557_v10 = vmul.f32 %v1523_v2, %v1523_v2 }
   0xf   : > { %v1540_v6 = vld [vmem:[%s2349_s0] sm:$0xff]  ;;  %v1562_v11 = vld [vmem:[%s2349_s0 + $0xc8] sm:$0xff]  ;;  %v1567_v12 = vld [vmem:[%s2349_s0 + $0xd0] sm:$0xff]  ;;  %v1581_v17 = vmul.f32 %v1528_v3, %v1528_v3  ;;  %v302_v20 = vmul.f32 %v1545_v7, %v1545_v7  ;;  %v279_v26 = vsel %vm251_vm0, %v1535_v5, 0.0  ;;  %p191_p3 = scmp.lt.s32.totalorder %s190_s29, 35  ;;  %vm1476_vm2 = vmmov 0  }
  0x10   : > { %v275_v13 = vadd.f32 %v274_v4, %v1523_v2  ;;  %v1573_v14 = vld [vmem:[%s2349_s0 + $0x10] sm:$0xff]  ;;  %v246_v15 = vadd.f32 %v1545_v7, %v1540_v6  ;;  %v301_v16 = vmul.f32 %v1540_v6, %v1540_v6  ;;  %v1586_v18 = vld [vmem:[%s2349_s0 + $0x18] sm:$0xff]  ;;  %v1591_v19 = vld [vmem:[%s2349_s0 + $0x20] sm:$0xff]  ;;  %v1604_v23 = vmul.f32 %v1562_v11, %v1562_v11 }
  0x11   : > { %v303_v21 = vmul.f32 %v1573_v14, %v1573_v14  ;;  %v1600_v22 = vld [vmem:[%s2349_s0 + $0x38] sm:$0xff]  ;;  %v1608_v24 = vmul.f32 %v1567_v12, %v1567_v12  ;;  %v1616_v27 = vld [vmem:[%s2349_s0 + $0x30] sm:$0xff]  ;;  %v304_v29 = vmul.f32 %v1586_v18, %v1586_v18  ;;  %v1624_v30 = vld [vmem:[%s2349_s0 + $0x40] sm:$0xff]  ;;  %v305_v32 = vmul.f32 %v1591_v19, %v1591_v19  ;;  %s2367_s29 = smov (!%p191_p3, %s190_s29), 35 }
  0x12   : > { %v276_v25 = vadd.f32 %v275_v13, %v1528_v3  ;;  %v247_v28 = vadd.f32 %v246_v15, %v1573_v14  ;;  %v1629_v31 = vld [vmem:[%s2349_s0 + $0x48] sm:$0xff]  ;;  %v307_v33 = vmul.f32 %v1616_v27, %v1616_v27  ;;  %v343_v34 = vadd.f32 %v302_v20, %v301_v16  ;;  %v1652_v40 = vld [vmem:[%s2349_s0 + $0x50] sm:$0xff]  ;;  %v1671_v48 = vld [vmem:[%s2349_s0 + $0x78] sm:$0xff]  ;;  %s1346_s30 = sshll.u32 %s2367_s29, 3  ;;  %s1440_s16 = smul.u32 56, %s2367_s29 }
  0x13   : > { %v1638_v35 = vld [vmem:[%s2349_s0 + $0x68] sm:$0xff]  ;;  %v256_v36 = vadd.f32 %v1624_v30, %v1600_v22  ;;  %v308_v41 = vmul.f32 %v1600_v22, %v1600_v22  ;;  %v309_v42 = vmul.f32 %v1624_v30, %v1624_v30  ;;  %v252_v43 = vsel %vm251_vm0, %v1616_v27, 0.0  ;;  %v1666_v47 = vld [vmem:[%s2349_s0 + $0x70] sm:$0xff]  ;;  %v1678_v51 = vld [vmem:[%s2349_s0 + $0x58] sm:$0xff]  ;;  %s1946_s7 = scalar_lea.vmem %s2352_s3, %s1346_s30 }
  0x14   : > { %v277_v37 = vadd.f32 %v276_v25, %v1562_v11  ;;  %v1646_v38 = vld [vmem:[%s2349_s0 + $0x28] sm:$0xff]  ;;  %v248_v39 = vadd.f32 %v247_v28, %v1586_v18  ;;  %v344_v45 = vadd.f32 %v343_v34, %v303_v21  ;;  %v261_v52 = vsel %vm251_vm0, %v1638_v35, 0.0  ;;  %v1691_v58 = vld [vmem:[%s2349_s0 + $0x80] sm:$0xff]  ;;  %s2200_s10 = scalar_lea.vmem %s2353_s4, %s1440_s16 }
  0x15   : > { %v306_v44 = vmul.f32 %v1646_v38, %v1646_v38  ;;  %v257_v46 = vadd.f32 %v256_v36, %v1629_v31  ;;  %v310_v53 = vmul.f32 %v1629_v31, %v1629_v31  ;;  %v348_v55 = vsel %vm251_vm0, %v307_v33, 0.0  ;;  %v1697_v61 = vld [vmem:[%s2349_s0 + $0x60] sm:$0xff]  ;;  %v1709_v20 = vld [vmem:[%s2349_s0 + $0x88] sm:$0xff]  ;;  %v1718_v33 = vld [vmem:[%s2349_s0 + $0x90] sm:$0xff] }
  0x16   : > { %v278_v49 = vadd.f32 %v277_v37, %v1567_v12  ;;  %v249_v50 = vadd.f32 %v248_v39, %v1591_v19  ;;  %v345_v54 = vadd.f32 %v344_v45, %v304_v29  ;;  %v311_v57 = vmul.f32 %v1652_v40, %v1652_v40  ;;  %v1723_v34 = vld [vmem:[%s2349_s0 + $0xa0] sm:$0xff] }
  0x17   : > { %v258_v56 = vadd.f32 %v257_v46, %v1652_v40  ;;  %v352_v62 = vadd.f32 %v309_v42, %v308_v41  ;;  %v265_v63 = vadd.f32 %v1671_v48, %v1666_v47  ;;  %v312_v15 = vmul.f32 %v1678_v51, %v1678_v51  ;;  %v1737_v46 = vld [vmem:[%s2349_s0 + $0x98] sm:$0xff] }
  0x18   : > { %v280_v59 = vadd.f32 %v279_v26, %v278_v49  ;;  %v250_v60 = vadd.f32 %v249_v50, %v1646_v38  ;;  %v346_v4 = vadd.f32 %v345_v54, %v305_v32  ;;  %v314_v16 = vmul.f32 %v1638_v35, %v1638_v35  ;;  %v1745_v49 = vld [vmem:[%s2349_s0 + $0x118] sm:$0xff]  ;;  %v1750_v50 = vld [vmem:[%s2349_s0 + $0x120] sm:$0xff] }
  0x19   : > { %v259_v13 = vadd.f32 %v258_v56, %v1678_v51  ;;  %v353_v25 = vadd.f32 %v352_v62, %v310_v53  ;;  %v266_v26 = vadd.f32 %v265_v63, %v1691_v58  ;;  %v328_v28 = vmul.f32 %v1535_v5, %v1535_v5  ;;  %v1764_v56 = vld [vmem:[%s2349_s0 + $0xe8] sm:$0xff] }
  0x1a   : > { %281 = vadd.xlane.f32.xlu1 %v280_v59  ;;  %v253_v21 = vadd.f32 %v252_v43, %v250_v60  ;;  %v347_v29 = vadd.f32 %v346_v4, %v306_v44  ;;  %v370_v36 = vadd.f32 %v1553_v9, %v1549_v8  ;;  %v315_v37 = vmul.f32 %v1666_v47, %v1666_v47  ;;  %v1773_v63 = vld [vmem:[%s2349_s0 + $0x128] sm:$0xff] }
  0x1b   : > { %v260_v32 = vadd.f32 %v259_v13, %v1697_v61  ;;  %v313_v39 = vmul.f32 %v1697_v61, %v1697_v61  ;;  %v354_v41 = vadd.f32 %v353_v25, %v311_v57  ;;  %v267_v42 = vadd.f32 %v266_v26, %v1709_v20 }
  0x1c   : > { %254 = vadd.xlane.f32.xlu0 %v253_v21  ;;  %v316_v43 = vmul.f32 %v1671_v48, %v1671_v48  ;;  %v349_v44 = vadd.f32 %v348_v55, %v347_v29  ;;  %v371_v8 = vadd.f32 %v370_v36, %v1557_v10  ;;  %v317_v9 = vmul.f32 %v1691_v58, %v1691_v58  ;;  %v1759_v55 = vld [vmem:[%s2349_s0 + $0xe0] sm:$0xff] }
  0x1d   : > { %v262_v45 = vadd.f32 %v261_v52, %v260_v32  ;;  %v355_v52 = vadd.f32 %v354_v41, %v312_v15  ;;  %v357_v53 = vsel %vm251_vm0, %v314_v16, 0.0  ;;  %v268_v54 = vadd.f32 %v267_v42, %v1718_v33  ;;  %v1783_v16 = vld [vmem:[%s2349_s0 + $0xf0] sm:$0xff] }
  0x1e   : > { %v270_v10 = vsel %vm251_vm0, %v1723_v34, 0.0  ;;  %350 = vadd.xlane.f32.xlu1 %v349_v44  ;;  %v372_v57 = vadd.f32 %v371_v8, %v1581_v17  ;;  %v375_v59 = vsel %vm251_vm0, %v328_v28, 0.0  ;;  %v318_v60 = vmul.f32 %v1709_v20, %v1709_v20  ;;  %v1791_v28 = vld [vmem:[%s2349_s0 + $0x130] sm:$0xff]  ;;  %v1812_v44 = vld [vmem:[%s2349_s0 + $0x148] sm:$0xff] }
  0x1f   : > { %v361_v62 = vadd.f32 %v316_v43, %v315_v37  ;;  %v356_v4 = vadd.f32 %v355_v52, %v313_v39  ;;  %v269_v13 = vadd.f32 %v268_v54, %v1737_v46  ;;  %v319_v15 = vmul.f32 %v1718_v33, %v1718_v33  ;;  %v1807_v43 = vld [vmem:[%s2349_s0 + $0x138] sm:$0xff]  ;;  %2359 = vst [vmem:[#allocation2_spill] sm:$0xff] %v1812_v44 }
  0x20   : > { %263 = vadd.xlane.f32.xlu0 %v262_v45  ;;  %v292_v17 = vadd.f32 %v1750_v50, %v1745_v49  ;;  %v373_v21 = vadd.f32 %v372_v57, %v1604_v23  ;;  %v320_v25 = vmul.f32 %v1737_v46, %v1737_v46  ;;  %v283_v29 = vadd.f32 %v1764_v56, %v1759_v55  ;;  %v1801_v23 = vld [vmem:[%s2349_s0 + $0xf8] sm:$0xff]  ;;  %v1833_v57 = vld [vmem:[%s2349_s0 + $0x110] sm:$0xff] }
  0x21   : > { %v362_v26 = vadd.f32 %v361_v62, %v317_v9  ;;  %v358_v32 = vadd.f32 %v357_v53, %v356_v4  ;;  %v271_v36 = vadd.f32 %v270_v10, %v269_v13  ;;  %v321_v37 = vmul.f32 %v1723_v34, %v1723_v34  ;;  %v1821_v9 = vld [vmem:[%s2349_s0 + $0x100] sm:$0xff]  ;;  %2361 = vst [vmem:[#allocation4_spill] sm:$0xff] %v1833_v57 }
  0x22   : > { %v293_v39 = vadd.f32 %v292_v17, %v1773_v63  ;;  %v374_v41 = vadd.f32 %v373_v21, %v1608_v24  ;;  %v284_v45 = vadd.f32 %v283_v29, %v1783_v16  ;;  %v336_v8 = vmul.f32 %v1745_v49, %v1745_v49  ;;  %2360 = vst [vmem:[#allocation3_spill] sm:$0xff] %v1821_v9  ;;  %v1828_v10 = vld [vmem:[%s2349_s0 + $0x140] sm:$0xff] }
  0x23   : > { %v363_v42 = vadd.f32 %v362_v26, %v318_v60  ;;  %359 = vadd.xlane.f32.xlu1 %v358_v32  ;;  %v337_v52 = vmul.f32 %v1750_v50, %v1750_v50  ;;  %v338_v62 = vmul.f32 %v1773_v63, %v1773_v63  ;;  %v366_v4 = vsel %vm251_vm0, %v321_v37, 0.0 }
  0x24   : > { %272 = vadd.xlane.f32.xlu0 %v271_v36  ;;  %v294_v24 = vadd.f32 %v293_v39, %v1791_v28  ;;  %v376_v53 = vadd.f32 %v375_v59, %v374_v41  ;;  %v285_v60 = vadd.f32 %v284_v45, %v1801_v23  ;;  %v297_v13 = vsel %vm251_vm0, %v1812_v44, 0.0 }
  0x25   : > { %v364_v54 = vadd.f32 %v363_v42, %v319_v15  ;;  %v1845_v15 = vld [vmem:[%s2349_s0 + $0x108] sm:$0xff]  ;;  %v339_v17 = vmul.f32 %v1791_v28, %v1791_v28  ;;  %v388_v29 = vadd.f32 %v337_v52, %v336_v8  ;;  %v329_v32 = vmul.f32 %v1759_v55, %v1759_v55 }
  0x26   : > { %v295_v59 = vadd.f32 %v294_v24, %v1807_v43  ;;  %v286_v26 = vadd.f32 %v285_v60, %v1821_v9  ;;  %v288_v37 = vsel %vm251_vm0, %v1833_v57, 0.0  ;;  %v340_v39 = vmul.f32 %v1807_v43, %v1807_v43 }
  0x27   : > { %v365_v21 = vadd.f32 %v364_v54, %v320_v25  ;;  %377 = vadd.xlane.f32.xlu1 %v376_v53  ;;  %v330_v41 = vmul.f32 %v1764_v56, %v1764_v56  ;;  %v389_v45 = vadd.f32 %v388_v29, %v338_v62  ;;  %v331_v8 = vmul.f32 %v1783_v16, %v1783_v16 }
  0x28   : > { %v296_v36 = vadd.f32 %v295_v59, %v1828_v10  ;;  %v287_v25 = vadd.f32 %v286_v26, %v1845_v15  ;;  %v341_v52 = vmul.f32 %v1828_v10, %v1828_v10  ;;  %v342_v53 = vmul.f32 %v1812_v44, %v1812_v44 }
  0x29   : > { %v367_v42 = vadd.f32 %v366_v4, %v365_v21  ;;  %v390_v60 = vadd.f32 %v389_v45, %v339_v17  ;;  %v332_v59 = vmul.f32 %v1801_v23, %v1801_v23  ;;  %v379_v4 = vadd.f32 %v330_v41, %v329_v32 }
  0x2a   : > { %v298_v24 = vadd.f32 %v297_v13, %v296_v36  ;;  %v289_v54 = vadd.f32 %v288_v37, %v287_v25  ;;  %v333_v62 = vmul.f32 %v1821_v9, %v1821_v9  ;;  %v393_v13 = vsel %vm251_vm0, %v342_v53, 0.0 }
  0x2b   : > { %368 = vadd.xlane.f32.xlu0 %v367_v42  ;;  %v391_v21 = vadd.f32 %v390_v60, %v340_v39  ;;  %v380_v26 = vadd.f32 %v379_v4, %v331_v8  ;;  %v335_v29 = vmul.f32 %v1833_v57, %v1833_v57  ;;  %v334_v17 = vmul.f32 %v1845_v15, %v1845_v15 }
  0x2c   : > { %299 = vadd.xlane.f32.xlu1 %v298_v24  ;;  %v2354_v45 = vmov 0  }
  0x2d   : > { %v392_v36 = vadd.f32 %v391_v21, %v341_v52  ;;  %v381_v37 = vadd.f32 %v380_v26, %v332_v59  ;;  %v384_v32 = vsel %vm251_vm0, %v335_v29, 0.0  ;;  %1452 = vset.pattern.permute.xlu0 %v2354_v45  ;;  %1453 = vset.pattern.permute.xlu1 %v2354_v45 }
  0x2e   : > { %715 = vmatprep.mubr.bf16.mxu0 %v2354_v45  ;;  %838 = vmatprep.mubr.bf16.mxu1 %v2354_v45 }
  0x2f   : > { %290 = vadd.xlane.f32.xlu0 %v289_v54  ;;  %v394_v42 = vadd.f32 %v393_v13, %v392_v36  ;;  %v382_v25 = vadd.f32 %v381_v37, %v333_v62 }
  0x31   : > { %395 = vadd.xlane.f32.xlu1 %v394_v42  ;;  %v383_v39 = vadd.f32 %v382_v25, %v334_v17 }
  0x33   : > { %v385_v41 = vadd.f32 %v384_v32, %v383_v39 }
  0x35   : > { %386 = vadd.xlane.f32.xlu0 %v385_v41 }
  0xa7   : > { %v282_v8 = vpop.xlane.xlu1 %281 }
  0xa8   : > { %v1888_v17 = vmul.f32 0.0012755102, %v282_v8 }
  0xa9   : > { %v255_v24 = vpop.xlane.xlu0 %254 }
  0xaa   : > { %v1880_v52 = vmul.f32 0.0012755102, %v255_v24  ;;  %v412_v41 = vmul.f32 %v1888_v17, %v1888_v17 }
  0xab   : > { %v351_v53 = vpop.xlane.xlu1 %350 }
  0xac   : > { %v409_v54 = vmul.f32 %v1880_v52, %v1880_v52  ;;  %v403_v60 = vmul.f32 0.0012755102, %v351_v53 }
  0xad   : > { %v264_v59 = vpop.xlane.xlu0 %263 }
  0xae   : > { %v1884_v4 = vmul.f32 0.0012755102, %v264_v59  ;;  %v415_v21 = vsub.f32 %v403_v60, %v409_v54 }
  0xb0   : > { %v427_v62 = vadd.f32 1e-05, %v415_v21  ;;  %v360_v26 = vpop.xlane.xlu1 %359  ;;  %v410_v13 = vmul.f32 %v1884_v4, %v1884_v4 }
  0xb1   : > { %v404_v29 = vmul.f32 0.0012755102, %v360_v26  ;;  %v273_v36 = vpop.xlane.xlu0 %272 }
  0xb2   : > { %1454 = vrsqrt.f32 %v427_v62  ;;  %v1890_v42 = vmul.f32 0.0012755102, %v273_v36  ;;  %v421_v62 = vld [vmem:[%s2350_s1] sm:$0xff] }
  0xb3   : > { %v416_v37 = vsub.f32 %v404_v29, %v410_v13 }
  0xb4   : > { %v378_v25 = vpop.xlane.xlu1 %377  ;;  %v411_v53 = vmul.f32 %v1890_v42, %v1890_v42 }
  0xb5   : > { %v428_v32 = vadd.f32 1e-05, %v416_v37  ;;  %v406_v39 = vmul.f32 0.0012755102, %v378_v25 }
  0xb7   : > { %1456 = vrsqrt.f32 %v428_v32  ;;  %v418_v54 = vsub.f32 %v406_v39, %v412_v41  ;;  %v422_v39 = vld [vmem:[%s2350_s1 + $0x8] sm:$0xff] }
  0xb8   : > { %v369_v24 = vpop.xlane.xlu0 %368 }
  0xb9   : > { %v405_v60 = vmul.f32 0.0012755102, %v369_v24  ;;  %v300_v59 = vpop.xlane.xlu1 %299  ;;  %v430_v13 = vadd.f32 1e-05, %v418_v54 }
  0xba   : > { %v402_v21 = vmul.f32 0.0012755102, %v300_v59 }
  0xbb   : > { %v417_v8 = vsub.f32 %v405_v60, %v411_v53 }
  0xbc   : > { %v1455_v26 = vpop.eup %1454  ;;  %v291_v36 = vpop.xlane.xlu0 %290  ;;  %v414_v25 = vmul.f32 %v402_v21, %v402_v21 }
  0xbd   : > { %v429_v29 = vadd.f32 1e-05, %v417_v8  ;;  %v439_v37 = vmul.f32 %v1455_v26, %v421_v62  ;;  %v401_v41 = vmul.f32 0.0012755102, %v291_v36  ;;  %v423_v26 = vld [vmem:[%s2350_s1 + $0x10] sm:$0xff]  ;;  %v424_v36 = vld [vmem:[%s2350_s1 + $0x18] sm:$0xff] }
  0xbe   : > { %v396_v32 = vpop.xlane.xlu1 %395 }
  0xbf   : > { %1458 = vrsqrt.f32 %v429_v29  ;;  %465 = vperm.xlu0 %1452, %v439_v37   ;;  %v408_v24 = vmul.f32 0.0012755102, %v396_v32  ;;  %v413_v57 = vmul.f32 %v401_v41, %v401_v41 }
  0xc0   : > { %1460 = vrsqrt.f32 %v430_v13 }
  0xc1   : > { %v1457_v53 = vpop.eup %1456  ;;  %v420_v60 = vsub.f32 %v408_v24, %v414_v25 }
  0xc2   : > { %v440_v59 = vmul.f32 %v1457_v53, %v422_v39  ;;  %v387_v45 = vpop.xlane.xlu0 %386  ;;  %v425_v39 = vld [vmem:[%s2350_s1 + $0x20] sm:$0xff] }
  0xc3   : > { %v432_v54 = vadd.f32 1e-05, %v420_v60  ;;  %v407_v8 = vmul.f32 0.0012755102, %v387_v45  ;;  %v426_v45 = vld [vmem:[%s2350_s1 + $0x28] sm:$0xff] }
  0xc4   : > { %470 = vperm.xlu1 %1453, %v440_v59  }
  0xc5   : > { %1462 = vrsqrt.f32 %v432_v54  ;;  %v419_v62 = vsub.f32 %v407_v8, %v413_v57  ;;  %v451_v8 = vmul.f32 %v439_v37, %v1880_v52  ;;  %v447_v52 = vld [vmem:[%s2351_s2 + $0x10] sm:$0xff] }
  0xc7   : > { %v431_v9 = vadd.f32 1e-05, %v419_v62  ;;  %v445_v62 = vld [vmem:[%s2351_s2] sm:$0xff] }
  0xc9   : > { %v1459_v29 = vpop.eup %1458  ;;  %1464 = vrsqrt.f32 %v431_v9  ;;  %v450_v9 = vld [vmem:[%s2351_s2 + $0x28] sm:$0xff] }
  0xca   : > { %v441_v44 = vmul.f32 %v1459_v29, %v423_v26  ;;  %v1461_v13 = vpop.eup %1460  ;;  %v457_v26 = vsub.f32 %v445_v62, %v451_v8  ;;  %v452_v29 = vmul.f32 %v440_v59, %v1884_v4  ;;  %v448_v4 = vld [vmem:[%s2351_s2 + $0x18] sm:$0xff] }
  0xcb   : > { %v442_v25 = vmul.f32 %v1461_v13, %v424_v36  ;;  %v446_v13 = vld [vmem:[%s2351_s2 + $0x8] sm:$0xff] }
  0xcc   : > { %475 = vperm.xlu1 %1453, %v441_v44   ;;  %v453_v36 = vmul.f32 %v441_v44, %v1890_v42 }
  0xce   : > { %v459_v37 = vsub.f32 %v447_v52, %v453_v36 }
  0xcf   : > { %v1463_v57 = vpop.eup %1462 }
  0xd0   : > { %480 = vperm.xlu1 %1453, %v442_v25   ;;  %v444_v32 = vmul.f32 %v1463_v57, %v426_v45  ;;  %v454_v45 = vmul.f32 %v442_v25, %v1888_v17  ;;  %v628_v25 = vld [vmem:[%s1946_s7] sm:$0xff] }
  0xd2   : > { %490 = vperm.xlu0 %1452, %v444_v32   ;;  %v456_v24 = vmul.f32 %v444_v32, %v402_v21  ;;  %v458_v21 = vsub.f32 %v446_v13, %v452_v29  ;;  %v460_v59 = vsub.f32 %v448_v4, %v454_v45  ;;  %v449_v32 = vld [vmem:[%s2351_s2 + $0x20] sm:$0xff] }
  0xd3   : > { %v1465_v53 = vpop.eup %1464 }
  0xd4   : > { %v443_v60 = vmul.f32 %v1465_v53, %v425_v39  ;;  %v462_v54 = vsub.f32 %v450_v9, %v456_v24  ;;  %v629_v9 = vld [vmem:[%s1946_s7 + $0x8] sm:$0xff] }
  0xd6   : > { %485 = vperm.xlu1 %1453, %v443_v60   ;;  %562 = vperm.xlu0 %1452, %v462_v54   ;;  %v455_v57 = vmul.f32 %v443_v60, %v401_v41  ;;  %v1954_v60 = vpack.c.bf16 %v629_v9, %v628_v25 }
  0xd8   : > { %v461_v44 = vsub.f32 %v449_v32, %v455_v57 }
  0xda   : > { %537 = vperm.xlu1 %1453, %v457_v26  }
  0xde   : > { %542 = vperm.xlu1 %1453, %v458_v21  }
  0xe2   : > { %547 = vperm.xlu1 %1453, %v459_v37  }
  0xe6   : > { %552 = vperm.xlu1 %1453, %v460_v59  }
  0xea   : > { %557 = vperm.xlu1 %1453, %v461_v44  }
 0x13e   : > { %v466_v24 = vpop.permute.xlu0 %465 }
 0x13f   : > { %v494_v54 = vmul.f32 %v466_v24, %v1545_v7  ;;  %v496_v8 = vmul.f32 %v466_v24, %v1586_v18  ;;  %v493_v62 = vmul.f32 %v466_v24, %v1540_v6  ;;  %v495_v26 = vmul.f32 %v466_v24, %v1573_v14 }
 0x140   : > { %v1962_v13 = vmul.f32 %v466_v24, %v1646_v38  ;;  %v1965_v21 = vmul.f32 %v466_v24, %v1591_v19  ;;  %v1968_v36 = vmul.f32 %v466_v24, %v1616_v27 }
 0x143   : > { %v471_v42 = vpop.permute.xlu1 %470 }
 0x144   : > { %v501_v29 = vmul.f32 %v471_v42, %v1624_v30  ;;  %v503_v52 = vmul.f32 %v471_v42, %v1652_v40  ;;  %v500_v7 = vmul.f32 %v471_v42, %v1600_v22  ;;  %v502_v18 = vmul.f32 %v471_v42, %v1629_v31 }
 0x145   : > { %v505_v6 = vmul.f32 %v471_v42, %v1697_v61  ;;  %v1989_v59 = vmul.f32 %v471_v42, %v1678_v51  ;;  %v1992_v57 = vmul.f32 %v471_v42, %v1638_v35 }
 0x14b   : > { %v476_v39 = vpop.permute.xlu1 %475 }
 0x14c   : > { %v508_v45 = vmul.f32 %v476_v39, %v1671_v48  ;;  %v510_v4 = vmul.f32 %v476_v39, %v1709_v20  ;;  %v1999_v48 = vmul.f32 %v476_v39, %v1737_v46  ;;  %v2002_v20 = vmul.f32 %v476_v39, %v1718_v33 }
 0x14d   : > { %v2009_v42 = vmul.f32 %v476_v39, %v1723_v34 }
 0x14f   : > { %v1940_v17 = vpop.permute.xlu1 %480 }
 0x150   : > { %v515_v35 = vmul.f32 %v1940_v17, %v1518_v1  ;;  %v517_v51 = vmul.f32 %v1940_v17, %v1528_v3 }
 0x151   : > { %v1980_v27 = vpop.permute.xlu0 %490 }
 0x152   : > { %v529_v33 = vmul.f32 %v1980_v27, %v1750_v50  ;;  %v531_v1 = vmul.f32 %v1980_v27, %v1791_v28  ;;  %v528_v3 = vmul.f32 %v1980_v27, %v1745_v49  ;;  %v530_v34 = vmul.f32 %v1980_v27, %v1773_v63 }
 0x155   : > { %v1948_v41 = vpop.permute.xlu1 %485  ;;  %v2017_v46 = vpop.permute.xlu0 %562 }
 0x156   : > { %v522_v49 = vmul.f32 %v1948_v41, %v1764_v56  ;;  %v601_v63 = vadd.f32 %v2017_v46, %v529_v33  ;;  %v523_v56 = vmul.f32 %v1948_v41, %v1783_v16 }
 0x159   : > { %v1952_v53 = vpop.permute.xlu1 %537 }
 0x15a   : > { %v566_v30 = vadd.f32 %v1952_v53, %v494_v54  ;;  %v568_v38 = vadd.f32 %v1952_v53, %v496_v8  ;;  %v565_v19 = vadd.f32 %v1952_v53, %v493_v62  ;;  %v567_v37 = vadd.f32 %v1952_v53, %v495_v26 }
 0x15b   : > { %v507_v54 = vmul.f32 %v476_v39, %v1666_v47  ;;  %v509_v8 = vmul.f32 %v476_v39, %v1691_v58  ;;  %v514_v47 = vmul.f32 %v1940_v17, %v1513_v0  ;;  %v516_v58 = vmul.f32 %v1940_v17, %v1523_v2 }
 0x15c   : > { %v519_v0 = vmul.f32 %v1940_v17, %v1567_v12  ;;  %v524_v12 = vmul.f32 %v1948_v41, %v1801_v23 }
 0x15d   : > { %v1974_v14 = vpop.permute.xlu1 %542 }
 0x15e   : > { %v573_v40 = vadd.f32 %v1974_v14, %v501_v29  ;;  %v575_v22 = vadd.f32 %v1974_v14, %v503_v52  ;;  %v572_v31 = vadd.f32 %v1974_v14, %v500_v7  ;;  %v574_v61 = vadd.f32 %v1974_v14, %v502_v18 }
 0x15f   : > { %v521_v18 = vmul.f32 %v1948_v41, %v1759_v55 }
 0x160   : > { %v608_v32 = vpack.c.bf16 %v573_v40, %v566_v30  ;;  %v610_v44 = vpack.c.bf16 %v575_v22, %v568_v38  ;;  %v607_v25 = vpack.c.bf16 %v572_v31, %v565_v19  ;;  %v609_v9 = vpack.c.bf16 %v574_v61, %v567_v37 }
 0x161   : > { %v1994_v24 = vpop.permute.xlu1 %547  ;;  %v603_v22 = vadd.f32 %v2017_v46, %v531_v1  ;;  %v600_v31 = vadd.f32 %v2017_v46, %v528_v3  ;;  %v577_v61 = vadd.f32 %v1974_v14, %v505_v6 }
 0x162   : > { %683 = vmatprep.subr.bf16.mxu0 %v608_v32  ;;  %806 = vmatprep.subr.bf16.mxu1 %v610_v44  ;;  %v580_v2 = vadd.f32 %v1994_v24, %v508_v45  ;;  %v582_v62 = vadd.f32 %v1994_v24, %v510_v4  ;;  %v579_v50 = vadd.f32 %v1994_v24, %v507_v54 }
 0x163   : > { %684 = vmatpush1.bf16.msra.mxu0 %v607_v25  ;;  %807 = vmatpush1.bf16.msra.mxu1 %v609_v9  ;;  %v581_v26 = vadd.f32 %v1994_v24, %v509_v8  ;;  %v602_v32 = vadd.f32 %v2017_v46, %v530_v34  ;;  %v518_v44 = vmul.f32 %v1940_v17, %v1562_v11  ;;  %v630_v34 = vld [vmem:[%s1946_s7 + $0x10] sm:$0xff] }
 0x164   : > { %v570_v9 = vadd.f32 %v1952_v53, %v1962_v13  ;;  %v576_v8 = vadd.f32 %v1974_v14, %v1989_v59  ;;  %v569_v13 = vadd.f32 %v1952_v53, %v1965_v21  ;;  %v571_v59 = vadd.f32 %v1952_v53, %v1968_v36  ;;  %v2362_v53 = vld [vmem:[#allocation2_spill] sm:$0xff] }
 0x165   : > { %v553_v39 = vpop.permute.xlu1 %552  ;;  %v534_v36 = vmul.f32 %v1980_v27, %v2362_v53 }
 0x166   : > { %v587_v29 = vadd.f32 %v553_v39, %v515_v35  ;;  %v589_v28 = vadd.f32 %v553_v39, %v517_v51  ;;  %v586_v52 = vadd.f32 %v553_v39, %v514_v47  ;;  %v588_v7 = vadd.f32 %v553_v39, %v516_v58 }
 0x167   : > { %v578_v35 = vadd.f32 %v1974_v14, %v1992_v57  ;;  %v520_v51 = vmul.f32 %v1940_v17, %v1535_v5  ;;  %v612_v47 = vpack.c.bf16 %v577_v61, %v570_v9  ;;  %v591_v11 = vadd.f32 %v553_v39, %v519_v0  ;;  %v631_v0 = vld [vmem:[%s1946_s7 + $0x18] sm:$0xff] }
 0x168   : > { %v615_v30 = vpack.c.bf16 %v587_v29, %v580_v2  ;;  %v617_v38 = vpack.c.bf16 %v589_v28, %v582_v62  ;;  %v614_v19 = vpack.c.bf16 %v586_v52, %v579_v50  ;;  %v616_v37 = vpack.c.bf16 %v588_v7, %v581_v26  ;;  %v2364_v2 = vld [vmem:[#allocation4_spill] sm:$0xff] }
 0x169   : > { %v2038_v40 = vpop.permute.xlu1 %557  ;;  %v533_v58 = vmul.f32 %v1980_v27, %v1828_v10  ;;  %v532_v14 = vmul.f32 %v1980_v27, %v1807_v43  ;;  %v1475_v5 = vmov 0.0   ;;  %v584_v10 = vadd.f32 %v1994_v24, %v1999_v48  ;;  %v2363_v27 = vld [vmem:[#allocation3_spill] sm:$0xff] }
 0x16a   : > { %685 = vmatprep.subr.bf16.mxu0 %v615_v30  ;;  %808 = vmatprep.subr.bf16.mxu1 %v617_v38  ;;  %v594_v23 = vadd.f32 %v2038_v40, %v522_v49  ;;  %v596_v55 = vadd.f32 %v2038_v40, %v524_v12  ;;  %v593_v45 = vadd.f32 %v2038_v40, %v521_v18  ;;  %v2365_v29 = vmov 0   ;;  %v632_v12 = vld [vmem:[%s1946_s7 + $0x20] sm:$0xff]  ;;  %v633_v18 = vld [vmem:[%s1946_s7 + $0x28] sm:$0xff]  ;;  %v634_v30 = vld [vmem:[%s1946_s7 + $0x30] sm:$0xff] }
 0x16b   : > { %686 = vmatpush1.bf16.msra.mxu0 %v614_v19  ;;  %809 = vmatpush1.bf16.msra.mxu1 %v616_v37  ;;  %v595_v4 = vadd.f32 %v2038_v40, %v523_v56  ;;  %v590_v17 = vadd.f32 %v553_v39, %v518_v44  ;;  %v526_v57 = vmul.f32 %v1948_v41, %v1845_v15  ;;  %v635_v38 = vld [vmem:[%s1946_s7 + $0x38] sm:$0xff]  ;;  %v636_v37 = vld [vmem:[%s1946_s7 + $0x40] sm:$0xff] }
 0x16c   : > { %v622_v16 = vpack.c.bf16 %v601_v63, %v594_v23  ;;  %v624_v25 = vpack.c.bf16 %v603_v22, %v596_v55  ;;  %v621_v6 = vpack.c.bf16 %v600_v31, %v593_v45  ;;  %v611_v21 = vpack.c.bf16 %v576_v8, %v569_v13  ;;  %v638_v31 = vld [vmem:[%s1946_s7 + $0x50] sm:$0xff]  ;;  %v639_v56 = vld [vmem:[%s1946_s7 + $0x58] sm:$0xff]  ;;  %v640_v23 = vld [vmem:[%s1946_s7 + $0x60] sm:$0xff] }
 0x16d   : > { %v623_v54 = vpack.c.bf16 %v602_v32, %v595_v4  ;;  %v613_v33 = vpack.c.bf16 %v578_v35, %v571_v59  ;;  %v592_v1 = vadd.f32 %v553_v39, %v520_v51  ;;  %v619_v43 = vpack.c.bf16 %v591_v11, %v584_v10  ;;  %v641_v55 = vld [vmem:[%s1946_s7 + $0x68] sm:$0xff]  ;;  %v642_v4 = vld [vmem:[%s1946_s7 + $0x70] sm:$0xff]  ;;  %v643_v32 = vld [vmem:[%s1946_s7 + $0x78] sm:$0xff] }
 0x16e   : > { %687 = vmatprep.subr.bf16.mxu0 %v622_v16  ;;  %810 = vmatprep.subr.bf16.mxu1 %v624_v25  ;;  %v583_v48 = vadd.f32 %v1994_v24, %v2002_v20  ;;  %v598_v3 = vadd.f32 %v2038_v40, %v526_v57  ;;  %v585_v15 = vadd.f32 %v1994_v24, %v2009_v42  ;;  %v644_v16 = vld [vmem:[%s1946_s7 + $0x80] sm:$0xff]  ;;  %v645_v25 = vld [vmem:[%s1946_s7 + $0x88] sm:$0xff] }
 0x16f   : > { %688 = vmatpush1.bf16.msra.mxu0 %v621_v6  ;;  %811 = vmatpush1.bf16.msra.mxu1 %v623_v54  ;;  %v525_v39 = vmul.f32 %v1948_v41, %v2363_v27  ;;  %v527_v62 = vmul.f32 %v1948_v41, %v2364_v2  ;;  %v605_v20 = vadd.f32 %v2017_v46, %v533_v58 }
 0x170   : > { %929 = vmatprep.subr.bf16.mxu0 %v612_v47  ;;  %1398 = vmatprep.subr.bf16.mxu1 %v1475_v5  ;;  %v618_v50 = vpack.c.bf16 %v590_v17, %v583_v48  ;;  %v620_v26 = vpack.c.bf16 %v592_v1, %v585_v15  ;;  %v2096_v52 = vpack.c.bf16 %v631_v0, %v630_v34 }
 0x171   : > { %v597_v24 = vadd.f32 %v2038_v40, %v525_v39  ;;  %v599_v42 = vadd.f32 %v2038_v40, %v527_v62  ;;  %v626_v28 = vpack.c.bf16 %v605_v20, %v598_v3  ;;  %v604_v41 = vadd.f32 %v2017_v46, %v532_v14  ;;  %v637_v40 = vld [vmem:[%s1946_s7 + $0x48] sm:$0xff] }
 0x172   : > { %1348 = vmatmul.mubr.msk.bf16.vlgmr.msra.gmra.mrb[0].mxu0 %vm655_vm1, %v1954_v60  ;;  %1357 = vmatmul.mubr.msk.bf16.vlgmr.msra.gmra.mrb[0].mxu1 %vm655_vm1, %v1954_v60  ;;  %v606_v7 = vadd.f32 %v2017_v46, %v534_v36  ;;  %v648_v46 = vpack.c.bf16 %v633_v18, %v632_v12  ;;  %v649_v19 = vpack.c.bf16 %v635_v38, %v634_v30 }
 0x173   : > { %930 = vmatpush1.bf16.msra.mxu0 %v611_v21  ;;  %1399 = vmatpush3.bf16.msra.mxu1 %v613_v33  ;;  %v625_v49 = vpack.c.bf16 %v604_v41, %v597_v24  ;;  %v650_v22 = vpack.c.bf16 %v637_v40, %v636_v37  ;;  %v651_v61 = vpack.c.bf16 %v639_v56, %v638_v31 }
 0x174   : > { %931 = vmatprep.subr.bf16.mxu0 %v619_v43  ;;  %1400 = vmatprep.subr.bf16.mxu1 %v1475_v5  ;;  %v627_v63 = vpack.c.bf16 %v606_v7, %v599_v42  ;;  %v652_v45 = vpack.c.bf16 %v641_v55, %v640_v23  ;;  %v653_v44 = vpack.c.bf16 %v643_v32, %v642_v4 }
 0x175   : > { %725 = vmatprep.mubr.bf16.mxu0 %v2365_v29  ;;  %848 = vmatprep.mubr.bf16.mxu1 %v2365_v29  ;;  %v654_v6 = vpack.c.bf16 %v645_v25, %v644_v16 }
 0x177   : > { %932 = vmatpush1.bf16.msra.mxu0 %v618_v50  ;;  %1401 = vmatpush3.bf16.msra.mxu1 %v620_v26 }
 0x178   : > { %933 = vmatprep.subr.bf16.mxu0 %v626_v28  ;;  %1402 = vmatprep.subr.bf16.mxu1 %v1475_v5 }
 0x17a   : > { %1349 = vmatmul.mubr.msk.bf16.gmra.mrb[4].mxu0 %vm655_vm1, %v2096_v52  ;;  %1358 = vmatmul.mubr.msk.bf16.gmra.mrb[4].mxu1 %vm655_vm1, %v2096_v52 }
 0x17b   : > { %934 = vmatpush1.bf16.msra.mxu0 %v625_v49  ;;  %1403 = vmatpush3.bf16.msra.mxu1 %v627_v63 }
 0x17c   : > { %735 = vmatprep.mubr.bf16.mxu0 %v2365_v29  ;;  %858 = vmatprep.mubr.bf16.mxu1 %v2365_v29 }
 0x182   : > { %1350 = vmatmul.mubr.msk.bf16.gmra.mrb[8].mxu0 %vm655_vm1, %v648_v46  ;;  %1359 = vmatmul.mubr.msk.bf16.gmra.mrb[8].mxu1 %vm655_vm1, %v648_v46 }
 0x183   : > { %745 = vmatprep.mubr.bf16.mxu0 %v2365_v29  ;;  %868 = vmatprep.mubr.bf16.mxu1 %v2365_v29 }
 0x18a   : > { %1351 = vmatmul.mubr.msk.bf16.gmra.mrb[12].mxu0 %vm655_vm1, %v649_v19  ;;  %1360 = vmatmul.mubr.msk.bf16.gmra.mrb[12].mxu1 %vm655_vm1, %v649_v19 }
 0x18b   : > { %755 = vmatprep.mubr.bf16.mxu0 %v2365_v29  ;;  %878 = vmatprep.mubr.bf16.mxu1 %v2365_v29 }
 0x192   : > { %1352 = vmatmul.mubr.msk.bf16.gmra.mrb[16].mxu0 %vm655_vm1, %v650_v22  ;;  %1361 = vmatmul.mubr.msk.bf16.gmra.mrb[16].mxu1 %vm655_vm1, %v650_v22 }
 0x193   : > { %765 = vmatprep.mubr.bf16.mxu0 %v2365_v29  ;;  %888 = vmatprep.mubr.bf16.mxu1 %v2365_v29 }
 0x19a   : > { %1353 = vmatmul.mubr.msk.bf16.gmra.mrb[20].mxu0 %vm655_vm1, %v651_v61  ;;  %1362 = vmatmul.mubr.msk.bf16.gmra.mrb[20].mxu1 %vm655_vm1, %v651_v61 }
 0x19b   : > { %775 = vmatprep.mubr.bf16.mxu0 %v2365_v29  ;;  %898 = vmatprep.mubr.bf16.mxu1 %v2365_v29 }
 0x1a2   : > { %1354 = vmatmul.mubr.msk.bf16.gmra.mrb[24].mxu0 %vm655_vm1, %v652_v45  ;;  %1363 = vmatmul.mubr.msk.bf16.gmra.mrb[24].mxu1 %vm655_vm1, %v652_v45 }
 0x1a3   : > { %785 = vmatprep.mubr.bf16.mxu0 %v2365_v29  ;;  %908 = vmatprep.mubr.bf16.mxu1 %v2365_v29 }
 0x1aa   : > { %1355 = vmatmul.mubr.msk.bf16.gmra.mrb[28].mxu0 %vm655_vm1, %v653_v44  ;;  %1364 = vmatmul.mubr.msk.bf16.gmra.mrb[28].mxu1 %vm655_vm1, %v653_v44 }
 0x1ab   : > { %795 = vmatprep.mubr.bf16.mxu0 %v2365_v29  ;;  %918 = vmatprep.mubr.bf16.mxu1 %v2365_v29 }
 0x1b2   : > { %1356 = vmatmul.mubr.msk.bf16.gmra.mrb[32].mxu0 %vm655_vm1, %v654_v6  ;;  %1365 = vmatmul.mubr.msk.bf16.gmra.mrb[32].mxu1 %vm655_vm1, %v654_v6 }
 0x1b3   : > { %961 = vmatprep.mubr.bf16.mxu0 %v2365_v29  ;;  %1404 = vmatprep.mubr.msk.bf16.mxu1 %vm1476_vm2, %v1475_v5 }
 0x1ba   : > { %1366 = vmatmul.mubr.msk.bf16.vlgmr.msra.gmra.mrb[36].mxu0 %vm655_vm1, %v1954_v60  ;;  %1405 = vmatmul.mubr.msk.bf16.vlgmr.msra.gmra.mrb[36].mxu1 %vm655_vm1, %v1954_v60 }
 0x1bb   : > { %971 = vmatprep.mubr.bf16.mxu0 %v2365_v29  ;;  %1408 = vmatprep.mubr.msk.bf16.mxu1 %vm1476_vm2, %v1475_v5 }
 0x1c2   : > { %1367 = vmatmul.mubr.msk.bf16.gmra.mrb[40].mxu0 %vm655_vm1, %v2096_v52  ;;  %1409 = vmatmul.mubr.msk.bf16.gmra.mrb[40].mxu1 %vm655_vm1, %v2096_v52 }
 0x1c3   : > { %981 = vmatprep.mubr.bf16.mxu0 %v2365_v29  ;;  %1412 = vmatprep.mubr.msk.bf16.mxu1 %vm1476_vm2, %v1475_v5 }
 0x1ca   : > { %1368 = vmatmul.mubr.msk.bf16.gmra.mrb[44].mxu0 %vm655_vm1, %v648_v46  ;;  %1413 = vmatmul.mubr.msk.bf16.gmra.mrb[44].mxu1 %vm655_vm1, %v648_v46 }
 0x1cb   : > { %991 = vmatprep.mubr.bf16.mxu0 %v2365_v29  ;;  %1416 = vmatprep.mubr.msk.bf16.mxu1 %vm1476_vm2, %v1475_v5 }
 0x1d2   : > { %1369 = vmatmul.mubr.msk.bf16.gmra.mrb[48].mxu0 %vm655_vm1, %v649_v19  ;;  %1417 = vmatmul.mubr.msk.bf16.gmra.mrb[48].mxu1 %vm655_vm1, %v649_v19 }
 0x1d3   : > { %1001 = vmatprep.mubr.bf16.mxu0 %v2365_v29  ;;  %1420 = vmatprep.mubr.msk.bf16.mxu1 %vm1476_vm2, %v1475_v5 }
 0x1da   : > { %1370 = vmatmul.mubr.msk.bf16.gmra.mrb[52].mxu0 %vm655_vm1, %v650_v22  ;;  %1421 = vmatmul.mubr.msk.bf16.gmra.mrb[52].mxu1 %vm655_vm1, %v650_v22 }
 0x1db   : > { %1011 = vmatprep.mubr.bf16.mxu0 %v2365_v29  ;;  %1424 = vmatprep.mubr.msk.bf16.mxu1 %vm1476_vm2, %v1475_v5 }
 0x1e2   : > { %1371 = vmatmul.mubr.msk.bf16.gmra.mrb[56].mxu0 %vm655_vm1, %v651_v61  ;;  %1425 = vmatmul.mubr.msk.bf16.gmra.mrb[56].mxu1 %vm655_vm1, %v651_v61 }
 0x1e3   : > { %1021 = vmatprep.mubr.bf16.mxu0 %v2365_v29  ;;  %1428 = vmatprep.mubr.msk.bf16.mxu1 %vm1476_vm2, %v1475_v5 }
 0x1ea   : > { %1372 = vmatmul.mubr.msk.bf16.gmra.mrb[60].mxu0 %vm655_vm1, %v652_v45  ;;  %1429 = vmatmul.mubr.msk.bf16.gmra.mrb[60].mxu1 %vm655_vm1, %v652_v45 }
 0x1eb   : > { %1031 = vmatprep.mubr.bf16.mxu0 %v2365_v29  ;;  %1432 = vmatprep.mubr.msk.bf16.mxu1 %vm1476_vm2, %v1475_v5 }
 0x1f2   : > { %1373 = vmatmul.mubr.msk.bf16.gmra.mrb[64].mxu0 %vm655_vm1, %v653_v44  ;;  %1433 = vmatmul.mubr.msk.bf16.gmra.mrb[64].mxu1 %vm655_vm1, %v653_v44 }
 0x1f3   : > { %1041 = vmatprep.mubr.bf16.mxu0 %v2365_v29  ;;  %1436 = vmatprep.mubr.msk.bf16.mxu1 %vm1476_vm2, %v1475_v5 }
 0x1fa   : > { %1374 = vmatmul.mubr.msk.bf16.gmra.mrb[68].mxu0 %vm655_vm1, %v654_v6  ;;  %1437 = vmatmul.mubr.msk.bf16.gmra.mrb[68].mxu1 %vm655_vm1, %v654_v6 }
 0x245   : > { %v717_v60 = vpop.f32.mrb[0].mxu0  ;;  %v840_v9 = vpop.f32.mrb[0].mxu1 }
 0x246   : > { %1157 = vst [vmem:[%s2200_s10] sm:$0xff] %v717_v60  ;;  %1159 = vst [vmem:[%s2200_s10 + $0x10] sm:$0xff] %v840_v9  ;;  %v719_v54 = vpop.f32.mrb[1].mxu0  ;;  %v842_v8 = vpop.f32.mrb[1].mxu1 }
 0x247   : > { %1158 = vst [vmem:[%s2200_s10 + $0x8] sm:$0xff] %v719_v54  ;;  %1160 = vst [vmem:[%s2200_s10 + $0x18] sm:$0xff] %v842_v8  ;;  %v721_v35 = vpop.f32.mrb[2].mxu0  ;;  %v844_v51 = vpop.f32.mrb[2].mxu1 }
 0x248   : > { %1164 = vst [vmem:[%s2200_s10 + $0x38] sm:$0xff] %v721_v35  ;;  %1166 = vst [vmem:[%s2200_s10 + $0x48] sm:$0xff] %v844_v51  ;;  %v723_v47 = vpop.f32.mrb[3].mxu0  ;;  %v846_v11 = vpop.f32.mrb[3].mxu1 }
 0x249   : > { %1165 = vst [vmem:[%s2200_s10 + $0x40] sm:$0xff] %v723_v47  ;;  %1167 = vst [vmem:[%s2200_s10 + $0x50] sm:$0xff] %v846_v11 }
 0x24d   : > { %v727_v58 = vpop.f32.mrb[4].mxu0  ;;  %v850_v13 = vpop.f32.mrb[4].mxu1 }
 0x24e   : > { %1171 = vst [vmem:[%s2200_s10 + $0x70] sm:$0xff] %v727_v58  ;;  %1173 = vst [vmem:[%s2200_s10 + $0x80] sm:$0xff] %v850_v13  ;;  %v729_v59 = vpop.f32.mrb[5].mxu0  ;;  %v852_v14 = vpop.f32.mrb[5].mxu1 }
 0x24f   : > { %1172 = vst [vmem:[%s2200_s10 + $0x78] sm:$0xff] %v729_v59  ;;  %1174 = vst [vmem:[%s2200_s10 + $0x88] sm:$0xff] %v852_v14  ;;  %v731_v5 = vpop.f32.mrb[6].mxu0  ;;  %v854_v10 = vpop.f32.mrb[6].mxu1 }
 0x250   : > { %1178 = vst [vmem:[%s2200_s10 + $0xa8] sm:$0xff] %v731_v5  ;;  %1180 = vst [vmem:[%s2200_s10 + $0xb8] sm:$0xff] %v854_v10  ;;  %v733_v17 = vpop.f32.mrb[7].mxu0  ;;  %v856_v57 = vpop.f32.mrb[7].mxu1 }
 0x251   : > { %1179 = vst [vmem:[%s2200_s10 + $0xb0] sm:$0xff] %v733_v17  ;;  %1181 = vst [vmem:[%s2200_s10 + $0xc0] sm:$0xff] %v856_v57 }
 0x255   : > { %v737_v21 = vpop.f32.mrb[8].mxu0  ;;  %v860_v33 = vpop.f32.mrb[8].mxu1 }
 0x256   : > { %1185 = vst [vmem:[%s2200_s10 + $0xe0] sm:$0xff] %v737_v21  ;;  %1187 = vst [vmem:[%s2200_s10 + $0xf0] sm:$0xff] %v860_v33  ;;  %v739_v1 = vpop.f32.mrb[9].mxu0  ;;  %v862_v53 = vpop.f32.mrb[9].mxu1 }
 0x257   : > { %1186 = vst [vmem:[%s2200_s10 + $0xe8] sm:$0xff] %v739_v1  ;;  %1188 = vst [vmem:[%s2200_s10 + $0xf8] sm:$0xff] %v862_v53  ;;  %v741_v36 = vpop.f32.mrb[10].mxu0  ;;  %v864_v43 = vpop.f32.mrb[10].mxu1 }
 0x258   : > { %1192 = vst [vmem:[%s2200_s10 + $0x118] sm:$0xff] %v741_v36  ;;  %1194 = vst [vmem:[%s2200_s10 + $0x128] sm:$0xff] %v864_v43  ;;  %v743_v48 = vpop.f32.mrb[11].mxu0  ;;  %v866_v3 = vpop.f32.mrb[11].mxu1 }
 0x259   : > { %1193 = vst [vmem:[%s2200_s10 + $0x120] sm:$0xff] %v743_v48  ;;  %1195 = vst [vmem:[%s2200_s10 + $0x130] sm:$0xff] %v866_v3 }
 0x25d   : > { %v747_v15 = vpop.f32.mrb[12].mxu0  ;;  %v870_v34 = vpop.f32.mrb[12].mxu1 }
 0x25e   : > { %1199 = vst [vmem:[%s2200_s10 + $0x150] sm:$0xff] %v747_v15  ;;  %1201 = vst [vmem:[%s2200_s10 + $0x160] sm:$0xff] %v870_v34  ;;  %v749_v0 = vpop.f32.mrb[13].mxu0  ;;  %v872_v27 = vpop.f32.mrb[13].mxu1 }
 0x25f   : > { %1200 = vst [vmem:[%s2200_s10 + $0x158] sm:$0xff] %v749_v0  ;;  %1202 = vst [vmem:[%s2200_s10 + $0x168] sm:$0xff] %v872_v27  ;;  %v751_v39 = vpop.f32.mrb[14].mxu0  ;;  %v874_v2 = vpop.f32.mrb[14].mxu1 }
 0x260   : > { %1206 = vst [vmem:[%s2200_s10 + $0x188] sm:$0xff] %v751_v39  ;;  %1208 = vst [vmem:[%s2200_s10 + $0x198] sm:$0xff] %v874_v2  ;;  %v753_v62 = vpop.f32.mrb[15].mxu0  ;;  %v876_v50 = vpop.f32.mrb[15].mxu1 }
 0x261   : > { %1207 = vst [vmem:[%s2200_s10 + $0x190] sm:$0xff] %v753_v62  ;;  %1209 = vst [vmem:[%s2200_s10 + $0x1a0] sm:$0xff] %v876_v50 }
 0x265   : > { %v757_v20 = vpop.f32.mrb[16].mxu0  ;;  %v880_v26 = vpop.f32.mrb[16].mxu1 }
 0x266   : > { %1213 = vst [vmem:[%s2200_s10 + $0x1c0] sm:$0xff] %v757_v20  ;;  %1215 = vst [vmem:[%s2200_s10 + $0x1d0] sm:$0xff] %v880_v26  ;;  %v759_v29 = vpop.f32.mrb[17].mxu0  ;;  %v882_v24 = vpop.f32.mrb[17].mxu1 }
 0x267   : > { %1214 = vst [vmem:[%s2200_s10 + $0x1c8] sm:$0xff] %v759_v29  ;;  %1216 = vst [vmem:[%s2200_s10 + $0x1d8] sm:$0xff] %v882_v24  ;;  %v761_v42 = vpop.f32.mrb[18].mxu0  ;;  %v884_v28 = vpop.f32.mrb[18].mxu1 }
 0x268   : > { %1220 = vst [vmem:[%s2200_s10 + $0x1f8] sm:$0xff] %v761_v42  ;;  %1222 = vst [vmem:[%s2200_s10 + $0x208] sm:$0xff] %v884_v28  ;;  %v763_v52 = vpop.f32.mrb[19].mxu0  ;;  %v886_v41 = vpop.f32.mrb[19].mxu1 }
 0x269   : > { %1221 = vst [vmem:[%s2200_s10 + $0x200] sm:$0xff] %v763_v52  ;;  %1223 = vst [vmem:[%s2200_s10 + $0x210] sm:$0xff] %v886_v41 }
 0x26d   : > { %v767_v7 = vpop.f32.mrb[20].mxu0  ;;  %v890_v49 = vpop.f32.mrb[20].mxu1 }
 0x26e   : > { %1227 = vst [vmem:[%s2200_s10 + $0x230] sm:$0xff] %v767_v7  ;;  %1229 = vst [vmem:[%s2200_s10 + $0x240] sm:$0xff] %v890_v49  ;;  %v769_v63 = vpop.f32.mrb[21].mxu0  ;;  %v892_v12 = vpop.f32.mrb[21].mxu1 }
 0x26f   : > { %1228 = vst [vmem:[%s2200_s10 + $0x238] sm:$0xff] %v769_v63  ;;  %1230 = vst [vmem:[%s2200_s10 + $0x248] sm:$0xff] %v892_v12  ;;  %v771_v18 = vpop.f32.mrb[22].mxu0  ;;  %v894_v46 = vpop.f32.mrb[22].mxu1 }
 0x270   : > { %1234 = vst [vmem:[%s2200_s10 + $0x268] sm:$0xff] %v771_v18  ;;  %1236 = vst [vmem:[%s2200_s10 + $0x278] sm:$0xff] %v894_v46  ;;  %v773_v30 = vpop.f32.mrb[23].mxu0  ;;  %v896_v38 = vpop.f32.mrb[23].mxu1 }
 0x271   : > { %1235 = vst [vmem:[%s2200_s10 + $0x270] sm:$0xff] %v773_v30  ;;  %1237 = vst [vmem:[%s2200_s10 + $0x280] sm:$0xff] %v896_v38 }
 0x275   : > { %v777_v19 = vpop.f32.mrb[24].mxu0  ;;  %v900_v37 = vpop.f32.mrb[24].mxu1 }
 0x276   : > { %1241 = vst [vmem:[%s2200_s10 + $0x2a0] sm:$0xff] %v777_v19  ;;  %1243 = vst [vmem:[%s2200_s10 + $0x2b0] sm:$0xff] %v900_v37  ;;  %v779_v40 = vpop.f32.mrb[25].mxu0  ;;  %v902_v22 = vpop.f32.mrb[25].mxu1 }
 0x277   : > { %1242 = vst [vmem:[%s2200_s10 + $0x2a8] sm:$0xff] %v779_v40  ;;  %1244 = vst [vmem:[%s2200_s10 + $0x2b8] sm:$0xff] %v902_v22  ;;  %v781_v31 = vpop.f32.mrb[26].mxu0  ;;  %v904_v56 = vpop.f32.mrb[26].mxu1 }
 0x278   : > { %1248 = vst [vmem:[%s2200_s10 + $0x2d8] sm:$0xff] %v781_v31  ;;  %1250 = vst [vmem:[%s2200_s10 + $0x2e8] sm:$0xff] %v904_v56  ;;  %v783_v61 = vpop.f32.mrb[27].mxu0  ;;  %v906_v23 = vpop.f32.mrb[27].mxu1 }
 0x279   : > { %1249 = vst [vmem:[%s2200_s10 + $0x2e0] sm:$0xff] %v783_v61  ;;  %1251 = vst [vmem:[%s2200_s10 + $0x2f0] sm:$0xff] %v906_v23 }
 0x27d   : > { %v787_v55 = vpop.f32.mrb[28].mxu0  ;;  %v910_v45 = vpop.f32.mrb[28].mxu1 }
 0x27e   : > { %1255 = vst [vmem:[%s2200_s10 + $0x310] sm:$0xff] %v787_v55  ;;  %1257 = vst [vmem:[%s2200_s10 + $0x320] sm:$0xff] %v910_v45  ;;  %v789_v4 = vpop.f32.mrb[29].mxu0  ;;  %v912_v32 = vpop.f32.mrb[29].mxu1 }
 0x27f   : > { %1256 = vst [vmem:[%s2200_s10 + $0x318] sm:$0xff] %v789_v4  ;;  %1258 = vst [vmem:[%s2200_s10 + $0x328] sm:$0xff] %v912_v32  ;;  %v791_v44 = vpop.f32.mrb[30].mxu0  ;;  %v914_v16 = vpop.f32.mrb[30].mxu1 }
 0x280   : > { %1262 = vst [vmem:[%s2200_s10 + $0x348] sm:$0xff] %v791_v44  ;;  %1264 = vst [vmem:[%s2200_s10 + $0x358] sm:$0xff] %v914_v16  ;;  %v793_v25 = vpop.f32.mrb[31].mxu0  ;;  %v916_v6 = vpop.f32.mrb[31].mxu1 }
 0x281   : > { %1263 = vst [vmem:[%s2200_s10 + $0x350] sm:$0xff] %v793_v25  ;;  %1265 = vst [vmem:[%s2200_s10 + $0x360] sm:$0xff] %v916_v6 }
 0x285   : > { %v797_v60 = vpop.f32.mrb[32].mxu0  ;;  %v920_v9 = vpop.f32.mrb[32].mxu1 }
 0x286   : > { %1269 = vst [vmem:[%s2200_s10 + $0x380] sm:$0xff] %v797_v60  ;;  %1271 = vst [vmem:[%s2200_s10 + $0x390] sm:$0xff] %v920_v9  ;;  %v799_v54 = vpop.f32.mrb[33].mxu0  ;;  %v922_v8 = vpop.f32.mrb[33].mxu1 }
 0x287   : > { %1270 = vst [vmem:[%s2200_s10 + $0x388] sm:$0xff] %v799_v54  ;;  %1272 = vst [vmem:[%s2200_s10 + $0x398] sm:$0xff] %v922_v8  ;;  %v801_v35 = vpop.f32.mrb[34].mxu0  ;;  %v924_v51 = vpop.f32.mrb[34].mxu1 }
 0x288   : > { %1276 = vst [vmem:[%s2200_s10 + $0x3b8] sm:$0xff] %v801_v35  ;;  %1278 = vst [vmem:[%s2200_s10 + $0x3c8] sm:$0xff] %v924_v51  ;;  %v803_v47 = vpop.f32.mrb[35].mxu0  ;;  %v926_v11 = vpop.f32.mrb[35].mxu1 }
 0x289   : > { %1277 = vst [vmem:[%s2200_s10 + $0x3c0] sm:$0xff] %v803_v47  ;;  %1279 = vst [vmem:[%s2200_s10 + $0x3d0] sm:$0xff] %v926_v11 }
 0x28d   : > { %v963_v58 = vpop.f32.mrb[36].mxu0  ;;  %v1086_v13 = vpop.f32.mrb[36].mxu1 }
 0x28e   : > { %1161 = vst [vmem:[%s2200_s10 + $0x20] sm:$0xff] %v963_v58  ;;  %1163 = vst.msk [vmem:[%s2200_s10 + $0x30] sm:$0xff] %vm251_vm0, %v1086_v13  ;;  %v965_v59 = vpop.f32.mrb[37].mxu0  ;;  %v1406_v14 = vpop.f32.mrb[37].mxu1 }
 0x28f   : > { %1162 = vst [vmem:[%s2200_s10 + $0x28] sm:$0xff] %v965_v59  ;;  %v967_v5 = vpop.f32.mrb[38].mxu0  ;;  %v1089_v10 = vpop.f32.mrb[38].mxu1 }
 0x290   : > { %1168 = vst [vmem:[%s2200_s10 + $0x58] sm:$0xff] %v967_v5  ;;  %1170 = vst.msk [vmem:[%s2200_s10 + $0x68] sm:$0xff] %vm251_vm0, %v1089_v10  ;;  %v969_v17 = vpop.f32.mrb[39].mxu0  ;;  %v1407_v57 = vpop.f32.mrb[39].mxu1 }
 0x291   : > { %1169 = vst [vmem:[%s2200_s10 + $0x60] sm:$0xff] %v969_v17 }
 0x295   : > { %v973_v21 = vpop.f32.mrb[40].mxu0  ;;  %v1094_v33 = vpop.f32.mrb[40].mxu1 }
 0x296   : > { %1175 = vst [vmem:[%s2200_s10 + $0x90] sm:$0xff] %v973_v21  ;;  %1177 = vst.msk [vmem:[%s2200_s10 + $0xa0] sm:$0xff] %vm251_vm0, %v1094_v33  ;;  %v975_v1 = vpop.f32.mrb[41].mxu0  ;;  %v1410_v53 = vpop.f32.mrb[41].mxu1 }
 0x297   : > { %1176 = vst [vmem:[%s2200_s10 + $0x98] sm:$0xff] %v975_v1  ;;  %v977_v36 = vpop.f32.mrb[42].mxu0  ;;  %v1097_v43 = vpop.f32.mrb[42].mxu1 }
 0x298   : > { %1182 = vst [vmem:[%s2200_s10 + $0xc8] sm:$0xff] %v977_v36  ;;  %1184 = vst.msk [vmem:[%s2200_s10 + $0xd8] sm:$0xff] %vm251_vm0, %v1097_v43  ;;  %v979_v48 = vpop.f32.mrb[43].mxu0  ;;  %v1411_v3 = vpop.f32.mrb[43].mxu1 }
 0x299   : > { %1183 = vst [vmem:[%s2200_s10 + $0xd0] sm:$0xff] %v979_v48 }
 0x29d   : > { %v983_v15 = vpop.f32.mrb[44].mxu0  ;;  %v1102_v34 = vpop.f32.mrb[44].mxu1 }
 0x29e   : > { %1189 = vst [vmem:[%s2200_s10 + $0x100] sm:$0xff] %v983_v15  ;;  %1191 = vst.msk [vmem:[%s2200_s10 + $0x110] sm:$0xff] %vm251_vm0, %v1102_v34  ;;  %v985_v0 = vpop.f32.mrb[45].mxu0  ;;  %v1414_v27 = vpop.f32.mrb[45].mxu1 }
 0x29f   : > { %1190 = vst [vmem:[%s2200_s10 + $0x108] sm:$0xff] %v985_v0  ;;  %v987_v39 = vpop.f32.mrb[46].mxu0  ;;  %v1105_v2 = vpop.f32.mrb[46].mxu1 }
 0x2a0   : > { %1196 = vst [vmem:[%s2200_s10 + $0x138] sm:$0xff] %v987_v39  ;;  %1198 = vst.msk [vmem:[%s2200_s10 + $0x148] sm:$0xff] %vm251_vm0, %v1105_v2  ;;  %v989_v62 = vpop.f32.mrb[47].mxu0  ;;  %v1415_v50 = vpop.f32.mrb[47].mxu1 }
 0x2a1   : > { %1197 = vst [vmem:[%s2200_s10 + $0x140] sm:$0xff] %v989_v62 }
 0x2a5   : > { %v993_v20 = vpop.f32.mrb[48].mxu0  ;;  %v1110_v26 = vpop.f32.mrb[48].mxu1 }
 0x2a6   : > { %1203 = vst [vmem:[%s2200_s10 + $0x170] sm:$0xff] %v993_v20  ;;  %1205 = vst.msk [vmem:[%s2200_s10 + $0x180] sm:$0xff] %vm251_vm0, %v1110_v26  ;;  %v995_v29 = vpop.f32.mrb[49].mxu0  ;;  %v1418_v24 = vpop.f32.mrb[49].mxu1 }
 0x2a7   : > { %1204 = vst [vmem:[%s2200_s10 + $0x178] sm:$0xff] %v995_v29  ;;  %v997_v42 = vpop.f32.mrb[50].mxu0  ;;  %v1113_v28 = vpop.f32.mrb[50].mxu1 }
 0x2a8   : > { %1210 = vst [vmem:[%s2200_s10 + $0x1a8] sm:$0xff] %v997_v42  ;;  %1212 = vst.msk [vmem:[%s2200_s10 + $0x1b8] sm:$0xff] %vm251_vm0, %v1113_v28  ;;  %v999_v52 = vpop.f32.mrb[51].mxu0  ;;  %v1419_v41 = vpop.f32.mrb[51].mxu1 }
 0x2a9   : > { %1211 = vst [vmem:[%s2200_s10 + $0x1b0] sm:$0xff] %v999_v52 }
 0x2ad   : > { %v1003_v7 = vpop.f32.mrb[52].mxu0  ;;  %v1118_v49 = vpop.f32.mrb[52].mxu1 }
 0x2ae   : > { %1217 = vst [vmem:[%s2200_s10 + $0x1e0] sm:$0xff] %v1003_v7  ;;  %1219 = vst.msk [vmem:[%s2200_s10 + $0x1f0] sm:$0xff] %vm251_vm0, %v1118_v49  ;;  %v1005_v63 = vpop.f32.mrb[53].mxu0  ;;  %v1422_v12 = vpop.f32.mrb[53].mxu1 }
 0x2af   : > { %1218 = vst [vmem:[%s2200_s10 + $0x1e8] sm:$0xff] %v1005_v63  ;;  %v1007_v18 = vpop.f32.mrb[54].mxu0  ;;  %v1121_v46 = vpop.f32.mrb[54].mxu1 }
 0x2b0   : > { %1224 = vst [vmem:[%s2200_s10 + $0x218] sm:$0xff] %v1007_v18  ;;  %1226 = vst.msk [vmem:[%s2200_s10 + $0x228] sm:$0xff] %vm251_vm0, %v1121_v46  ;;  %v1009_v30 = vpop.f32.mrb[55].mxu0  ;;  %v1423_v38 = vpop.f32.mrb[55].mxu1 }
 0x2b1   : > { %1225 = vst [vmem:[%s2200_s10 + $0x220] sm:$0xff] %v1009_v30 }
 0x2b5   : > { %v1013_v19 = vpop.f32.mrb[56].mxu0  ;;  %v1126_v37 = vpop.f32.mrb[56].mxu1 }
 0x2b6   : > { %1231 = vst [vmem:[%s2200_s10 + $0x250] sm:$0xff] %v1013_v19  ;;  %1233 = vst.msk [vmem:[%s2200_s10 + $0x260] sm:$0xff] %vm251_vm0, %v1126_v37  ;;  %v1015_v40 = vpop.f32.mrb[57].mxu0  ;;  %v1426_v22 = vpop.f32.mrb[57].mxu1 }
 0x2b7   : > { %1232 = vst [vmem:[%s2200_s10 + $0x258] sm:$0xff] %v1015_v40  ;;  %v1017_v31 = vpop.f32.mrb[58].mxu0  ;;  %v1129_v56 = vpop.f32.mrb[58].mxu1 }
 0x2b8   : > { %1238 = vst [vmem:[%s2200_s10 + $0x288] sm:$0xff] %v1017_v31  ;;  %1240 = vst.msk [vmem:[%s2200_s10 + $0x298] sm:$0xff] %vm251_vm0, %v1129_v56  ;;  %v1019_v61 = vpop.f32.mrb[59].mxu0  ;;  %v1427_v23 = vpop.f32.mrb[59].mxu1 }
 0x2b9   : > { %1239 = vst [vmem:[%s2200_s10 + $0x290] sm:$0xff] %v1019_v61 }
 0x2bd   : > { %v1023_v55 = vpop.f32.mrb[60].mxu0  ;;  %v1134_v45 = vpop.f32.mrb[60].mxu1 }
 0x2be   : > { %1245 = vst [vmem:[%s2200_s10 + $0x2c0] sm:$0xff] %v1023_v55  ;;  %1247 = vst.msk [vmem:[%s2200_s10 + $0x2d0] sm:$0xff] %vm251_vm0, %v1134_v45  ;;  %v1025_v4 = vpop.f32.mrb[61].mxu0  ;;  %v1430_v32 = vpop.f32.mrb[61].mxu1 }
 0x2bf   : > { %1246 = vst [vmem:[%s2200_s10 + $0x2c8] sm:$0xff] %v1025_v4  ;;  %v1027_v44 = vpop.f32.mrb[62].mxu0  ;;  %v1137_v16 = vpop.f32.mrb[62].mxu1 }
 0x2c0   : > { %1252 = vst [vmem:[%s2200_s10 + $0x2f8] sm:$0xff] %v1027_v44  ;;  %1254 = vst.msk [vmem:[%s2200_s10 + $0x308] sm:$0xff] %vm251_vm0, %v1137_v16  ;;  %v1029_v25 = vpop.f32.mrb[63].mxu0  ;;  %v1431_v6 = vpop.f32.mrb[63].mxu1 }
 0x2c1   : > { %1253 = vst [vmem:[%s2200_s10 + $0x300] sm:$0xff] %v1029_v25 }
 0x2c5   : > { %v1033_v60 = vpop.f32.mrb[64].mxu0  ;;  %v1142_v9 = vpop.f32.mrb[64].mxu1 }
 0x2c6   : > { %1259 = vst [vmem:[%s2200_s10 + $0x330] sm:$0xff] %v1033_v60  ;;  %1261 = vst.msk [vmem:[%s2200_s10 + $0x340] sm:$0xff] %vm251_vm0, %v1142_v9  ;;  %v1035_v54 = vpop.f32.mrb[65].mxu0  ;;  %v1434_v8 = vpop.f32.mrb[65].mxu1 }
 0x2c7   : > { %1260 = vst [vmem:[%s2200_s10 + $0x338] sm:$0xff] %v1035_v54  ;;  %v1037_v35 = vpop.f32.mrb[66].mxu0  ;;  %v1145_v51 = vpop.f32.mrb[66].mxu1 }
 0x2c8   : > { %1266 = vst [vmem:[%s2200_s10 + $0x368] sm:$0xff] %v1037_v35  ;;  %1268 = vst.msk [vmem:[%s2200_s10 + $0x378] sm:$0xff] %vm251_vm0, %v1145_v51  ;;  %v1039_v47 = vpop.f32.mrb[67].mxu0  ;;  %v1435_v11 = vpop.f32.mrb[67].mxu1 }
 0x2c9   : > { %1267 = vst [vmem:[%s2200_s10 + $0x370] sm:$0xff] %v1039_v47 }
 0x2cd   : > { %v1043_v58 = vpop.f32.mrb[68].mxu0  ;;  %v1150_v13 = vpop.f32.mrb[68].mxu1 }
 0x2ce   : > { %1273 = vst [vmem:[%s2200_s10 + $0x3a0] sm:$0xff] %v1043_v58  ;;  %1275 = vst.msk [vmem:[%s2200_s10 + $0x3b0] sm:$0xff] %vm251_vm0, %v1150_v13  ;;  %v1045_v59 = vpop.f32.mrb[69].mxu0  ;;  %v1438_v14 = vpop.f32.mrb[69].mxu1 }
 0x2cf   : > { %1274 = vst [vmem:[%s2200_s10 + $0x3a8] sm:$0xff] %v1045_v59  ;;  %v1047_v5 = vpop.f32.mrb[70].mxu0  ;;  %v1153_v10 = vpop.f32.mrb[70].mxu1 }
 0x2d0   : > { %1280 = vst [vmem:[%s2200_s10 + $0x3d8] sm:$0xff] %v1047_v5  ;;  %1282 = vst.msk [vmem:[%s2200_s10 + $0x3e8] sm:$0xff] %vm251_vm0, %v1153_v10  ;;  %v1049_v17 = vpop.f32.mrb[71].mxu0  ;;  %v1439_v57 = vpop.f32.mrb[71].mxu1 }
 0x2d1   : > { %1281 = vst [vmem:[%s2200_s10 + $0x3e0] sm:$0xff] %v1049_v17 }
 0x2d2 PF: > { %s14_s15 = sadd.s32 1, %s1472_s15  }
 0x2d3   : > { %p11_p4 = scmp.ge.s32.totalorder %s14_s15, 4  }
 0x2d5   :  { %13 = sbr.rel (!%p11_p4) target bundleno = 1 (0x1), region = 66 }

</bundles_post_ra>
